<compile_context>
chip_gen: v7x
topology: tpu7x:2x2x1
jax: 0.10.0
libtpu: 0.0.40
codegen_flags: <defaults>
</compile_context>

<pallas_src>
import jax
import jax.numpy as jnp
from jax.experimental import pallas as pl
from jax.experimental.pallas import tpu as pltpu


def _linear_kernel(w_ref, b_ref, x_ref, o_ref):
    # w_ref: SMEM (3,) f32, b_ref: SMEM (1,) f32
    # x_ref: VMEM (3, bt) f32 (feature-major, batch on the lane axis)
    # o_ref: VMEM (1, bt) f32
    x = x_ref[...]
    y = (x[0:1, :] * w_ref[0]
         + x[1:2, :] * w_ref[1]
         + x[2:3, :] * w_ref[2]
         + b_ref[0])
    o_ref[...] = y.astype(o_ref.dtype)


def multivariate_linear_regression(x, weight, bias, *, feature_major=False):
    """Forward pass of nn.Linear(3, 1).

    x: (B, 3) f32 (or (3, B) f32 if feature_major=True), weight: (1, 3) f32,
    bias: (1,) f32  ->  (B, 1) f32.

    NOTE: at tiny batches (like the B=8 demo below) pallas_call launch/DMA
    overhead dominates and a fused XLA `x @ W.T + b` would be faster; the
    kernel is structured for the large-B streaming (HBM-bound) regime.
    """
    if feature_major:
        F, B = x.shape
        x_t = x                      # already (3, B): no transpose pass at all
    else:
        B, F = x.shape
        x_t = x.T                    # (3, B); XLA fuses this with the pad below
    assert F == 3 and weight.shape == (1, 3) and bias.shape == (1,)
    # Kernel layout math (8-sublane f32 tiles, SMEM scalar params) assumes f32.
    assert x.dtype == jnp.float32, "kernel is laid out for float32 inputs"
    w_flat = weight.astype(jnp.float32).reshape(3)
    b_flat = bias.astype(jnp.float32).reshape(1)

    # ---- batch-tile sizing from a VMEM budget --------------------------------
    # Per grid step (f32, both blocks pad to 8 sublanes):
    #   x block (3, bt)  -> 8 * bt * 4 = 32*bt bytes
    #   y block (1, bt)  -> 8 * bt * 4 = 32*bt bytes
    # Double-buffered: ~128*bt bytes.  Budget ~32 MiB -> bt up to 256K lanes,
    # which (with a 48 MiB scoped limit) leaves headroom on v7x's 64 MiB VMEM
    # and is far under v5e/v6e's 128 MiB physical.
    VMEM_TILE_BUDGET = 32 << 20
    bt_budget = ((VMEM_TILE_BUDGET // 128) // 128) * 128        # 256K lanes
    # Keep >=2 grid steps at large B so v7x can shard across both TensorCores;
    # at small B this just rounds the batch up to one 128-lane tile.
    bt_two_steps = max(128, ((pl.cdiv(B, 2) + 127) // 128) * 128)
    bt = min(bt_budget, bt_two_steps)

    b_pad = pl.cdiv(B, bt) * bt
    # Lane pad on the already-transposed array: fuses with the transpose into a
    # single pass (no separate zero-filled buffer that is written then re-read).
    if b_pad != B:
        x_t = jnp.pad(x_t, ((0, 0), (0, b_pad - B)))

    y_pad = pl.pallas_call(
        _linear_kernel,
        out_shape=jax.ShapeDtypeStruct((1, b_pad), jnp.float32),
        grid=(b_pad // bt,),
        in_specs=[
            pl.BlockSpec(memory_space=pltpu.MemorySpace.SMEM),   # weight (3,)
            pl.BlockSpec(memory_space=pltpu.MemorySpace.SMEM),   # bias (1,)
            pl.BlockSpec((3, bt), lambda i: (0, i)),             # x tile (3, bt)
        ],
        out_specs=pl.BlockSpec((1, bt), lambda i: (0, i)),
        compiler_params=pltpu.CompilerParams(
            dimension_semantics=("parallel",),
            vmem_limit_bytes=48 << 20),
    )(w_flat, b_flat, x_t)

    # Back to torch nn.Linear output layout (B, 1), dropping lane padding.
    return y_pad[0, :B].reshape(B, 1)


if __name__ == "__main__":
    key = jax.random.PRNGKey(0)
    kx, kw, kb = jax.random.split(key, 3)

    # Small batch of multivariate inputs, 3 features each (nn.Linear(3, 1)).
    batch = 8
    x = jax.random.normal(kx, (batch, 3), dtype=jnp.float32)

    # Mirror torch.nn.Linear(3, 1) init: U(-k, k), k = 1/sqrt(in_features).
    k = 1.0 / jnp.sqrt(3.0)
    weight = jax.random.uniform(kw, (1, 3), minval=-k, maxval=k, dtype=jnp.float32)
    bias = jax.random.uniform(kb, (1,), minval=-k, maxval=k, dtype=jnp.float32)

    y = multivariate_linear_regression(x, weight, bias)
    y = jax.block_until_ready(y)

    # Correctness check against plain-JAX reference of the torch forward.
    y_ref = x @ weight.T + bias
    assert y.shape == (batch, 1)
    assert jnp.allclose(y, y_ref, atol=1e-5, rtol=1e-5)

    print("KERNEL_OK")
</pallas_src>

<mosaic_0001>
module attributes {stable_mosaic.version = 11 : i64} {
  func.func @_linear_kernel(%arg0: i32, %arg1: memref<3xf32, #tpu.memory_space<smem>>, %arg2: memref<1xf32, #tpu.memory_space<smem>>, %arg3: memref<3x128xf32, #tpu.memory_space<vmem>>, %arg4: memref<1x128xf32, #tpu.memory_space<vmem>>) attributes {dimension_semantics = [#tpu.dimension_semantics<parallel>], iteration_bounds = array<i64: 1>, scalar_prefetch = 0 : i64, scratch_operands = 0 : i64, tpu.core_type = #tpu.core_type<tc>, window_params = [{transform_indices = @transform_0, window_bounds = array<i64: 3>}, {transform_indices = @transform_1, window_bounds = array<i64: 1>}, {transform_indices = @transform_2, window_bounds = array<i64: 3, 128>}, {transform_indices = @transform_3, window_bounds = array<i64: 1, 128>}]} {
    %c0 = arith.constant 0 : index
    %c0_0 = arith.constant 0 : index
    %0 = vector.load %arg3[%c0, %c0_0] : memref<3x128xf32, #tpu.memory_space<vmem>>, vector<3x128xf32>
    %1 = vector.extract_strided_slice %0 {offsets = [0, 0], sizes = [1, 128], strides = [1, 1]} : vector<3x128xf32> to vector<1x128xf32>
    %c0_1 = arith.constant 0 : index
    %2 = memref.load %arg1[%c0_1] : memref<3xf32, #tpu.memory_space<smem>>
    %3 = vector.broadcast %2 : f32 to vector<1x128xf32>
    %4 = arith.mulf %1, %3 : vector<1x128xf32>
    %5 = vector.extract_strided_slice %0 {offsets = [1, 0], sizes = [1, 128], strides = [1, 1]} : vector<3x128xf32> to vector<1x128xf32>
    %c1 = arith.constant 1 : index
    %6 = memref.load %arg1[%c1] : memref<3xf32, #tpu.memory_space<smem>>
    %7 = vector.broadcast %6 : f32 to vector<1x128xf32>
    %8 = arith.mulf %5, %7 : vector<1x128xf32>
    %9 = arith.addf %4, %8 : vector<1x128xf32>
    %10 = vector.extract_strided_slice %0 {offsets = [2, 0], sizes = [1, 128], strides = [1, 1]} : vector<3x128xf32> to vector<1x128xf32>
    %c2 = arith.constant 2 : index
    %11 = memref.load %arg1[%c2] : memref<3xf32, #tpu.memory_space<smem>>
    %12 = vector.broadcast %11 : f32 to vector<1x128xf32>
    %13 = arith.mulf %10, %12 : vector<1x128xf32>
    %14 = arith.addf %9, %13 : vector<1x128xf32>
    %c0_2 = arith.constant 0 : index
    %15 = memref.load %arg2[%c0_2] : memref<1xf32, #tpu.memory_space<smem>>
    %16 = vector.broadcast %15 : f32 to vector<1x128xf32>
    %17 = arith.addf %14, %16 : vector<1x128xf32>
    %c0_3 = arith.constant 0 : index
    %c0_4 = arith.constant 0 : index
    %18 = vector.load %arg4[%c0_3, %c0_4] : memref<1x128xf32, #tpu.memory_space<vmem>>, vector<1x128xf32>
    tpu.vector_store %arg4[%c0_3, %c0_4], %17 {strides = array<i32>} : memref<1x128xf32, #tpu.memory_space<vmem>>, vector<1x128xf32>,
    return
  }
  func.func @transform_0(%arg0: i32) -> i32 {
    %c0_i32 = arith.constant 0 : i32
    %c0_i32_0 = arith.constant 0 : i32
    return %c0_i32 : i32
  }
  func.func @transform_1(%arg0: i32) -> i32 {
    %c0_i32 = arith.constant 0 : i32
    %c0_i32_0 = arith.constant 0 : i32
    return %c0_i32 : i32
  }
  func.func @transform_2(%arg0: i32) -> (i32, i32) {
    %c0_i32 = arith.constant 0 : i32
    %c0_i32_0 = arith.constant 0 : i32
    return %c0_i32, %arg0 : i32, i32
  }
  func.func @transform_3(%arg0: i32) -> (i32, i32) {
    %c0_i32 = arith.constant 0 : i32
    %c0_i32_0 = arith.constant 0 : i32
    return %c0_i32, %arg0 : i32, i32
  }
}

</mosaic_0001>

<bundles_post_ra>
// kernel: tpu_custom_call.1
= control target key start
LH: loop header
LB: loop body
LE: loop exit
PB: predicated region body
PF: predicated region fallthrough
CT: control target
= control target key end

     0   :  { %9 = vsyncpa [#allocation5], 0  ;;  %s151_s0 = inlined_call_operand.vmem [shape: f32[3], index: 0, kind: input, shape index: {}]   ;;  %s152_s1 = inlined_call_operand.<no memory space> [shape: f32[1], index: 1, kind: input, shape index: {}]   ;;  %s153_s2 = inlined_call_operand.vmem [shape: f32[3,128], index: 2, kind: input, shape index: {}]   ;;  %s154_s3 = inlined_call_operand.hbm [shape: f32[1,128], index: 3, kind: output, shape index: {}]  }
   0x1   :  { %10 = vsyncpa [#allocation4], 0  ;;  %s17_s14 = sshll.u32 %s151_s0, 4  ;;  %s18_s14 = int_to_ptr.vmem [resolvable:$true] %s17_s14 }
   0x2   :  { %s70_s15 = scalar_lea.vmem %s18_s14, 16  ;;  %p75_p1 = scmp.lt.s32.totalorder %s18_s14, %s18_s14 }
   0x3   :  { %p71_p0 = scmp.ne.s32.totalorder %s18_s14, %s70_s15  ;;  %p76_p2 = scmp.lt.s32.totalorder %s70_s15, %s70_s15 }
   0x5   :  { %p77_p3 = por %p76_p2, %p75_p1 }
   0x7   :  { %p78_p4 = pnand %p77_p3, %p71_p0 }
   0x9   :  { %81 = shalt.err (!%p78_p4)
}
   0xa   :  { %s108_s16 = smov [#allocation3]  }
   0xb   :  { %20 = dma.vmem_to_smem %s18_s14, 16, %s108_s16, [#allocation5]  }
   0xc   :  { %104 = dma.done.wait [#allocation5], 16  }
   0xd   :  { %105 = vsyncadd [#allocation5], 4294967280 }
   0xe   :  { %28 = sfence }
   0xf   :  { %s30_s17 = sld [smem:[#allocation3]]  ;;  %s66_s18 = sld [smem:[#allocation3 + $0x1]]  ;;  %v29_v0 = vld [vmem:[%s153_s2] sm:$0x7]  ;;  %v48_v10 = vstv %s152_s1 }
  0x10   :  { %s67_s19 = sld [smem:[#allocation3 + $0x2]]  ;;  %s109_s23 = smov [#allocation6]  }
  0x11   :  { %s57_s24 = sshll.u32 %s109_s23, 4  ;;  %s58_s24 = int_to_ptr.vmem [resolvable:$true] %s57_s24 }
  0x12   :  { %s82_s2 = scalar_lea.vmem %s58_s24, 16  ;;  %s86_s25 = scalar_lea.vmem %s58_s24, 32 }
  0x13   :  { %p83_p5 = scmp.ne.s32.totalorder %s58_s24, %s82_s2  ;;  %p87_p6 = scmp.lt.s32.totalorder %s58_s24, %s58_s24 }
  0x14   :  { %p88_p7 = scmp.lt.s32.totalorder %s86_s25, %s82_s2 }
  0x15   :  { %v31_v1 = vstv %s30_s17  ;;  %v34_v2 = vstv %s66_s18 }
  0x16   :  { %v32_v3 = vmul.f32 %v31_v1, %v29_v0  ;;  %v35_v4 = vmul.f32 %v34_v2, %v29_v0  ;;  %v41_v5 = vstv %s67_s19  ;;  %p89_p8 = por %p88_p7, %p87_p6 }
  0x17   :  { %v42_v6 = vmul.f32 %v41_v5, %v29_v0 }
  0x18   :  { %v37_v7 = vrot.slane %v35_v4, 1  ;;  %p90_p9 = pnand %p89_p8, %p83_p5 }
  0x19   :  { %v44_v8 = vrot.slane %v42_v6, 2 }
  0x1a   :  { %v39_v9 = vadd.f32 %v37_v7, %v32_v3 }
  0x1c   :  { %v46_v11 = vadd.f32 %v44_v8, %v39_v9 }
  0x1e   :  { %v49_v12 = vadd.f32 %v48_v10, %v46_v11 }
  0x20   :  { %50 = vst [vmem:[#allocation6] sm:$0x1] %v49_v12 }
  0x21   :  { %93 = shalt.err (!%p90_p9)
}
  0x22   :  { %s94_s28 = scalar_lea.hbm %s154_s3, 16 }
  0x23   :  { %p95_p10 = scmp.ne.s32.totalorder %s154_s3, %s94_s28  ;;  %p98_p11 = scmp.lt.u32.totalorder %s94_s28, %s154_s3 }
  0x25   :  { %p100_p12 = pnand %p98_p11, %p95_p10 }
  0x27   :  { %103 = shalt.err (!%p100_p12)
}
  0x28   :  { %60 = dma.vmem_to_hbm [thread:$0]  %s58_s24, 16, %s154_s3, [#allocation4]  }
  0x29   :  { %106 = dma.done.wait [#allocation4], 16  }
  0x2a   :  { %107 = vsyncadd [#allocation4], 4294967280 }
  0x2b   :  { %64 = vsyncpa [#allocation4], 1 }
  0x2c   :  { %65 = vsyncpa [#allocation5], 1 }

</bundles_post_ra>
